<compile_context>
chip_gen: v7x
topology: tpu7x:2x2x1
jax: 0.10.0
libtpu: 0.0.40
codegen_flags: <defaults>
</compile_context>

<pallas_src>
import functools

import jax
import jax.numpy as jnp
from jax.experimental import pallas as pl
from jax.experimental.pallas import tpu as pltpu

EPS = 1e-5  # nn.LayerNorm default eps
LANE = 128
SUBLANE = 8


def _round_up(x, m):
    return (x + m - 1) // m * m


def _cdiv(a, b):
    return (a + b - 1) // b


def _layernorm(h, gamma, beta, real_dim):
    """Single-pass LayerNorm over the first `real_dim` lanes.

    Padded lanes of `h` are exactly zero (padded weight columns and biases are
    zero), so they contribute nothing to sum / sum-of-squares and no lane mask
    is needed. Padded lanes of gamma/beta are zero, so padded output lanes stay
    exactly zero as well.
    """
    inv_n = jnp.float32(1.0 / real_dim)
    mu = jnp.sum(h, axis=-1, keepdims=True) * inv_n
    msq = jnp.sum(h * h, axis=-1, keepdims=True) * inv_n
    var = jnp.maximum(msq - mu * mu, 0.0)
    return (h - mu) * jax.lax.rsqrt(var + jnp.float32(EPS)) * gamma + beta


def actor_kernel(x_ref, w1_ref, w2_ref, w3_ref, p_ref, o_ref, *,
                 fc1_dims, fc2_dims):
    fc1_p = w1_ref.shape[1]
    fc2_p = w2_ref.shape[1]
    n_act = w3_ref.shape[1]

    # bf16 operands for the MXU, f32 accumulation / elementwise everywhere else.
    x = x_ref[...].astype(jnp.bfloat16)

    # Packed small params: rows 0..6 of a single (8, P) f32 VMEM tile.
    b1 = p_ref[0:1, :fc1_p]
    g1 = p_ref[1:2, :fc1_p]
    be1 = p_ref[2:3, :fc1_p]
    b2 = p_ref[3:4, :fc2_p]
    g2 = p_ref[4:5, :fc2_p]
    be2 = p_ref[5:6, :fc2_p]
    b3 = p_ref[6:7, :n_act]

    # fc1 + LayerNorm + ReLU
    h = jnp.dot(x, w1_ref[...], preferred_element_type=jnp.float32) + b1
    h = _layernorm(h, g1, be1, fc1_dims)
    h = jnp.maximum(h, 0.0)

    # fc2 + LayerNorm + ReLU
    h = jnp.dot(h.astype(jnp.bfloat16), w2_ref[...],
                preferred_element_type=jnp.float32) + b2
    h = _layernorm(h, g2, be2, fc2_dims)
    h = jnp.maximum(h, 0.0)

    # mu head + tanh; output is written at the real action width (narrow HBM
    # writeback — the handful of masked stores per tile is not the limiter).
    h = jnp.dot(h.astype(jnp.bfloat16), w3_ref[...],
                preferred_element_type=jnp.float32) + b3
    o_ref[...] = jnp.tanh(h)


@functools.partial(jax.jit, static_argnames=("dims", "block_b"))
def actor_forward(state, packed, dims, block_b=2048):
    w1p, w2p, w3p, pvec = packed
    d_in, fc1, fc2, n_act = dims

    DIN, FC1P = w1p.shape
    FC2P = w2p.shape[1]
    P = pvec.shape[1]

    B = state.shape[0]
    # Batch tiling: equalized tiles, each a multiple of the f32 sublane count.
    Bp0 = _round_up(max(B, 1), SUBLANE)
    num_tiles = _cdiv(Bp0, block_b)
    # v7x megacore: when the batch is big enough, make sure there are >=2
    # parallel grid steps so both TensorCores get work. Tiny batches stay as a
    # single step (extra steps only add ~0.35us/step overhead there).
    if num_tiles == 1 and Bp0 >= 1024:
        num_tiles = 2
    TB = _round_up(_cdiv(Bp0, num_tiles), SUBLANE)
    Bp = TB * num_tiles

    # Only the batch axis is padded (zero rows, dropped below); the feature
    # axis stays at the real d_in — no inflated input stream.
    xs = state.astype(jnp.float32)
    if Bp != B:
        xs = jnp.pad(xs, ((0, Bp - B), (0, 0)))

    kern = functools.partial(actor_kernel, fc1_dims=fc1, fc2_dims=fc2)

    out = pl.pallas_call(
        kern,
        out_shape=jax.ShapeDtypeStruct((Bp, n_act), jnp.float32),
        grid=(Bp // TB,),
        in_specs=[
            pl.BlockSpec((TB, DIN), lambda i: (i, 0)),     # state: tiled on batch
            pl.BlockSpec((DIN, FC1P), lambda i: (0, 0)),   # w1: VMEM-resident
            pl.BlockSpec((FC1P, FC2P), lambda i: (0, 0)),  # w2: VMEM-resident
            pl.BlockSpec((FC2P, n_act), lambda i: (0, 0)), # w3: VMEM-resident
            pl.BlockSpec((SUBLANE, P), lambda i: (0, 0)),  # packed biases / LN params
        ],
        out_specs=pl.BlockSpec((TB, n_act), lambda i: (i, 0)),
        compiler_params=pltpu.CompilerParams(
            dimension_semantics=("parallel",)),
    )(xs, w1p, w2p, w3p, pvec)

    return out[:B]


def init_params(key, input_dim, fc1_dims, fc2_dims, n_actions):
    """Deterministic init mirroring the PyTorch __init__ (uniform ranges)."""
    ks = jax.random.split(key, 6)
    f1 = 1.0 / jnp.sqrt(jnp.float32(fc1_dims))   # fc1.weight.size()[0] == fc1_dims
    f2 = 1.0 / jnp.sqrt(jnp.float32(fc2_dims))   # fc2.weight.size()[0] == fc2_dims
    f3 = 0.003

    # Weights stored transposed relative to PyTorch: [in, out]
    w1 = jax.random.uniform(ks[0], (input_dim, fc1_dims), jnp.float32, -f1, f1)
    b1 = jax.random.uniform(ks[1], (1, fc1_dims), jnp.float32, -f1, f1)
    w2 = jax.random.uniform(ks[2], (fc1_dims, fc2_dims), jnp.float32, -f2, f2)
    b2 = jax.random.uniform(ks[3], (1, fc2_dims), jnp.float32, -f2, f2)
    w3 = jax.random.uniform(ks[4], (fc2_dims, n_actions), jnp.float32, -f3, f3)
    b3 = jax.random.uniform(ks[5], (1, n_actions), jnp.float32, -f3, f3)

    # nn.LayerNorm default elementwise affine params: weight=1, bias=0
    g1 = jnp.ones((1, fc1_dims), jnp.float32)
    be1 = jnp.zeros((1, fc1_dims), jnp.float32)
    g2 = jnp.ones((1, fc2_dims), jnp.float32)
    be2 = jnp.zeros((1, fc2_dims), jnp.float32)

    return (w1, b1, g1, be1, w2, b2, g2, be2, w3, b3)


def pack_params(params):
    """Pad hidden dims to lane multiples of 128 (zero padding keeps LayerNorm /
    matmul semantics exact), store weights in bf16 for the MXU, and pack the
    seven small vectors into one (8, P) f32 tile. Done once, outside the kernel.

    The contraction dim of w1 (d_in) and the output dim of w3 (n_actions) are
    NOT padded: input and output streams stay at their real widths.
    """
    (w1, b1, g1, be1, w2, b2, g2, be2, w3, b3) = params
    d_in, fc1 = w1.shape
    fc2 = w2.shape[1]
    n_act = w3.shape[1]

    FC1P = _round_up(fc1, LANE)
    FC2P = _round_up(fc2, LANE)
    P = max(FC1P, FC2P, _round_up(n_act, LANE))

    w1p = jnp.zeros((d_in, FC1P), jnp.float32).at[:, :fc1].set(w1)
    w2p = jnp.zeros((FC1P, FC2P), jnp.float32).at[:fc1, :fc2].set(w2)
    w3p = jnp.zeros((FC2P, n_act), jnp.float32).at[:fc2, :].set(w3)

    # bf16 operands (f32 accumulation happens on the MXU inside the kernel).
    w1p = w1p.astype(jnp.bfloat16)
    w2p = w2p.astype(jnp.bfloat16)
    w3p = w3p.astype(jnp.bfloat16)

    pvec = jnp.zeros((SUBLANE, P), jnp.float32)
    pvec = (pvec.at[0, :fc1].set(b1[0])
                .at[1, :fc1].set(g1[0])
                .at[2, :fc1].set(be1[0])
                .at[3, :fc2].set(b2[0])
                .at[4, :fc2].set(g2[0])
                .at[5, :fc2].set(be2[0])
                .at[6, :n_act].set(b3[0]))

    packed = (w1p, w2p, w3p, pvec)
    dims = (int(d_in), int(fc1), int(fc2), int(n_act))
    return packed, dims


def reference_forward(state, params):
    """Pure-JAX f32 reference (unpadded, two-pass LayerNorm) for a sanity check."""
    (w1, b1, g1, be1, w2, b2, g2, be2, w3, b3) = params

    def ln(h, g, b):
        mu = jnp.mean(h, axis=-1, keepdims=True)
        var = jnp.mean((h - mu) * (h - mu), axis=-1, keepdims=True)
        return (h - mu) * jax.lax.rsqrt(var + EPS) * g + b

    h = state @ w1 + b1
    h = jnp.maximum(ln(h, g1, be1), 0.0)
    h = h @ w2 + b2
    h = jnp.maximum(ln(h, g2, be2), 0.0)
    return jnp.tanh(h @ w3 + b3)


if __name__ == "__main__":
    # Small shapes consistent with the module: input_dims=(8,), fc1=32, fc2=32,
    # n_actions=4, batch=2.
    B, D_IN, FC1, FC2, N_ACT = 2, 8, 32, 32, 4

    key = jax.random.PRNGKey(0)
    k_state, k_params = jax.random.split(key)
    state = jax.random.normal(k_state, (B, D_IN), jnp.float32)

    params = init_params(k_params, D_IN, FC1, FC2, N_ACT)
    packed, dims = pack_params(params)

    out = actor_forward(state, packed, dims)
    out = jax.block_until_ready(out)

    ref = reference_forward(state, params)
    assert out.shape == (B, N_ACT)
    # bf16 matmul operands (f32 accumulation): tolerance loosened vs the pure-f32
    # path per the perf review.
    assert jnp.allclose(out, ref, atol=5e-3, rtol=5e-3), "mismatch vs reference"

    print("KERNEL_OK")
</pallas_src>

<mosaic_0001>
module attributes {stable_mosaic.version = 11 : i64} {
  func.func @actor_kernel(%arg0: i32, %arg1: memref<8x8xf32, #tpu.memory_space<vmem>>, %arg2: memref<8x128xbf16, #tpu.memory_space<vmem>>, %arg3: memref<128x128xbf16, #tpu.memory_space<vmem>>, %arg4: memref<128x4xbf16, #tpu.memory_space<vmem>>, %arg5: memref<8x128xf32, #tpu.memory_space<vmem>>, %arg6: memref<8x4xf32, #tpu.memory_space<vmem>>) attributes {dimension_semantics = [#tpu.dimension_semantics<parallel>], iteration_bounds = array<i64: 1>, scalar_prefetch = 0 : i64, scratch_operands = 0 : i64, tpu.core_type = #tpu.core_type<tc>, window_params = [{transform_indices = @transform_0, window_bounds = array<i64: 8, 8>}, {pipeline_mode = #tpu.pipeline_mode<synchronous>, transform_indices = @transform_1, window_bounds = array<i64: 8, 128>}, {pipeline_mode = #tpu.pipeline_mode<synchronous>, transform_indices = @transform_2, window_bounds = array<i64: 128, 128>}, {pipeline_mode = #tpu.pipeline_mode<synchronous>, transform_indices = @transform_3, window_bounds = array<i64: 128, 4>}, {pipeline_mode = #tpu.pipeline_mode<synchronous>, transform_indices = @transform_4, window_bounds = array<i64: 8, 128>}, {transform_indices = @transform_5, window_bounds = array<i64: 8, 4>}]} {
    %c0 = arith.constant 0 : index
    %c0_0 = arith.constant 0 : index
    %0 = vector.load %arg1[%c0, %c0_0] : memref<8x8xf32, #tpu.memory_space<vmem>>, vector<8x8xf32>
    %1 = arith.truncf %0 : vector<8x8xf32> to vector<8x8xbf16>
    %c0_1 = arith.constant 0 : index
    %c0_2 = arith.constant 0 : index
    %2 = vector.load %arg5[%c0_1, %c0_2] : memref<8x128xf32, #tpu.memory_space<vmem>>, vector<1x128xf32>
    %c1 = arith.constant 1 : index
    %c0_3 = arith.constant 0 : index
    %3 = vector.load %arg5[%c1, %c0_3] : memref<8x128xf32, #tpu.memory_space<vmem>>, vector<1x128xf32>
    %c2 = arith.constant 2 : index
    %c0_4 = arith.constant 0 : index
    %4 = vector.load %arg5[%c2, %c0_4] : memref<8x128xf32, #tpu.memory_space<vmem>>, vector<1x128xf32>
    %c3 = arith.constant 3 : index
    %c0_5 = arith.constant 0 : index
    %5 = vector.load %arg5[%c3, %c0_5] : memref<8x128xf32, #tpu.memory_space<vmem>>, vector<1x128xf32>
    %c4 = arith.constant 4 : index
    %c0_6 = arith.constant 0 : index
    %6 = vector.load %arg5[%c4, %c0_6] : memref<8x128xf32, #tpu.memory_space<vmem>>, vector<1x128xf32>
    %c5 = arith.constant 5 : index
    %c0_7 = arith.constant 0 : index
    %7 = vector.load %arg5[%c5, %c0_7] : memref<8x128xf32, #tpu.memory_space<vmem>>, vector<1x128xf32>
    %c6 = arith.constant 6 : index
    %c0_8 = arith.constant 0 : index
    %8 = vector.load %arg5[%c6, %c0_8] : memref<8x128xf32, #tpu.memory_space<vmem>>, vector<1x4xf32>
    %c0_9 = arith.constant 0 : index
    %c0_10 = arith.constant 0 : index
    %9 = vector.load %arg2[%c0_9, %c0_10] : memref<8x128xbf16, #tpu.memory_space<vmem>>, vector<8x128xbf16>
    %cst = arith.constant dense<0.000000e+00> : vector<8x128xf32>
    %10 = tpu.matmul %1, %9, %cst {dimension_numbers = #tpu.dot_dimension_numbers<[1], [0], [0], [1], [0, 0, 1, 1], [], []>} : vector<8x8xbf16>, vector<8x128xbf16>, vector<8x128xf32> -> vector<8x128xf32>
    %11 = vector.broadcast %2 : vector<1x128xf32> to vector<8x128xf32>
    %12 = arith.addf %10, %11 : vector<8x128xf32>
    %cst_11 = arith.constant dense<0.000000e+00> : vector<8xf32>
    %13 = vector.multi_reduction <add>, %12, %cst_11 [1] : vector<8x128xf32> to vector<8xf32>
    %14 = vector.shape_cast %13 : vector<8xf32> to vector<8x1xf32>
    %cst_12 = arith.constant 3.125000e-02 : f32
    %15 = vector.broadcast %cst_12 : f32 to vector<8x1xf32>
    %16 = arith.mulf %14, %15 : vector<8x1xf32>
    %17 = arith.mulf %12, %12 : vector<8x128xf32>
    %cst_13 = arith.constant dense<0.000000e+00> : vector<8xf32>
    %18 = vector.multi_reduction <add>, %17, %cst_13 [1] : vector<8x128xf32> to vector<8xf32>
    %19 = vector.shape_cast %18 : vector<8xf32> to vector<8x1xf32>
    %cst_14 = arith.constant 3.125000e-02 : f32
    %20 = vector.broadcast %cst_14 : f32 to vector<8x1xf32>
    %21 = arith.mulf %19, %20 : vector<8x1xf32>
    %22 = arith.mulf %16, %16 : vector<8x1xf32>
    %23 = arith.subf %21, %22 : vector<8x1xf32>
    %cst_15 = arith.constant 0.000000e+00 : f32
    %24 = vector.broadcast %cst_15 : f32 to vector<8x1xf32>
    %25 = arith.maximumf %23, %24 : vector<8x1xf32>
    %26 = vector.broadcast %16 : vector<8x1xf32> to vector<8x128xf32>
    %27 = arith.subf %12, %26 : vector<8x128xf32>
    %cst_16 = arith.constant 9.99999974E-6 : f32
    %28 = vector.broadcast %cst_16 : f32 to vector<8x1xf32>
    %29 = arith.addf %25, %28 : vector<8x1xf32>
    %30 = math.rsqrt %29 : vector<8x1xf32>
    %31 = vector.broadcast %30 : vector<8x1xf32> to vector<8x128xf32>
    %32 = arith.mulf %27, %31 : vector<8x128xf32>
    %33 = vector.broadcast %3 : vector<1x128xf32> to vector<8x128xf32>
    %34 = arith.mulf %32, %33 : vector<8x128xf32>
    %35 = vector.broadcast %4 : vector<1x128xf32> to vector<8x128xf32>
    %36 = arith.addf %34, %35 : vector<8x128xf32>
    %cst_17 = arith.constant 0.000000e+00 : f32
    %37 = vector.broadcast %cst_17 : f32 to vector<8x128xf32>
    %38 = arith.maximumf %36, %37 : vector<8x128xf32>
    %39 = arith.truncf %38 : vector<8x128xf32> to vector<8x128xbf16>
    %c0_18 = arith.constant 0 : index
    %c0_19 = arith.constant 0 : index
    %40 = vector.load %arg3[%c0_18, %c0_19] : memref<128x128xbf16, #tpu.memory_space<vmem>>, vector<128x128xbf16>
    %cst_20 = arith.constant dense<0.000000e+00> : vector<8x128xf32>
    %41 = tpu.matmul %39, %40, %cst_20 {dimension_numbers = #tpu.dot_dimension_numbers<[1], [0], [0], [1], [0, 0, 1, 1], [], []>} : vector<8x128xbf16>, vector<128x128xbf16>, vector<8x128xf32> -> vector<8x128xf32>
    %42 = vector.broadcast %5 : vector<1x128xf32> to vector<8x128xf32>
    %43 = arith.addf %41, %42 : vector<8x128xf32>
    %cst_21 = arith.constant dense<0.000000e+00> : vector<8xf32>
    %44 = vector.multi_reduction <add>, %43, %cst_21 [1] : vector<8x128xf32> to vector<8xf32>
    %45 = vector.shape_cast %44 : vector<8xf32> to vector<8x1xf32>
    %cst_22 = arith.constant 3.125000e-02 : f32
    %46 = vector.broadcast %cst_22 : f32 to vector<8x1xf32>
    %47 = arith.mulf %45, %46 : vector<8x1xf32>
    %48 = arith.mulf %43, %43 : vector<8x128xf32>
    %cst_23 = arith.constant dense<0.000000e+00> : vector<8xf32>
    %49 = vector.multi_reduction <add>, %48, %cst_23 [1] : vector<8x128xf32> to vector<8xf32>
    %50 = vector.shape_cast %49 : vector<8xf32> to vector<8x1xf32>
    %cst_24 = arith.constant 3.125000e-02 : f32
    %51 = vector.broadcast %cst_24 : f32 to vector<8x1xf32>
    %52 = arith.mulf %50, %51 : vector<8x1xf32>
    %53 = arith.mulf %47, %47 : vector<8x1xf32>
    %54 = arith.subf %52, %53 : vector<8x1xf32>
    %cst_25 = arith.constant 0.000000e+00 : f32
    %55 = vector.broadcast %cst_25 : f32 to vector<8x1xf32>
    %56 = arith.maximumf %54, %55 : vector<8x1xf32>
    %57 = vector.broadcast %47 : vector<8x1xf32> to vector<8x128xf32>
    %58 = arith.subf %43, %57 : vector<8x128xf32>
    %cst_26 = arith.constant 9.99999974E-6 : f32
    %59 = vector.broadcast %cst_26 : f32 to vector<8x1xf32>
    %60 = arith.addf %56, %59 : vector<8x1xf32>
    %61 = math.rsqrt %60 : vector<8x1xf32>
    %62 = vector.broadcast %61 : vector<8x1xf32> to vector<8x128xf32>
    %63 = arith.mulf %58, %62 : vector<8x128xf32>
    %64 = vector.broadcast %6 : vector<1x128xf32> to vector<8x128xf32>
    %65 = arith.mulf %63, %64 : vector<8x128xf32>
    %66 = vector.broadcast %7 : vector<1x128xf32> to vector<8x128xf32>
    %67 = arith.addf %65, %66 : vector<8x128xf32>
    %cst_27 = arith.constant 0.000000e+00 : f32
    %68 = vector.broadcast %cst_27 : f32 to vector<8x128xf32>
    %69 = arith.maximumf %67, %68 : vector<8x128xf32>
    %70 = arith.truncf %69 : vector<8x128xf32> to vector<8x128xbf16>
    %c0_28 = arith.constant 0 : index
    %c0_29 = arith.constant 0 : index
    %71 = vector.load %arg4[%c0_28, %c0_29] : memref<128x4xbf16, #tpu.memory_space<vmem>>, vector<128x4xbf16>
    %cst_30 = arith.constant dense<0.000000e+00> : vector<8x4xf32>
    %72 = tpu.matmul %70, %71, %cst_30 {dimension_numbers = #tpu.dot_dimension_numbers<[1], [0], [0], [1], [0, 0, 1, 1], [], []>} : vector<8x128xbf16>, vector<128x4xbf16>, vector<8x4xf32> -> vector<8x4xf32>
    %73 = vector.broadcast %8 : vector<1x4xf32> to vector<8x4xf32>
    %74 = arith.addf %72, %73 : vector<8x4xf32>
    %75 = math.tanh %74 : vector<8x4xf32>
    %c0_31 = arith.constant 0 : index
    %c0_32 = arith.constant 0 : index
    %76 = vector.load %arg6[%c0_31, %c0_32] : memref<8x4xf32, #tpu.memory_space<vmem>>, vector<8x4xf32>
    tpu.vector_store %arg6[%c0_31, %c0_32], %75 {strides = array<i32>} : memref<8x4xf32, #tpu.memory_space<vmem>>, vector<8x4xf32>,
    return
  }
  func.func @transform_0(%arg0: i32) -> (i32, i32) {
    %c0_i32 = arith.constant 0 : i32
    %c0_i32_0 = arith.constant 0 : i32
    return %arg0, %c0_i32 : i32, i32
  }
  func.func @transform_1(%arg0: i32) -> (i32, i32) {
    %c0_i32 = arith.constant 0 : i32
    %c0_i32_0 = arith.constant 0 : i32
    %c0_i32_1 = arith.constant 0 : i32
    return %c0_i32, %c0_i32_0 : i32, i32
  }
  func.func @transform_2(%arg0: i32) -> (i32, i32) {
    %c0_i32 = arith.constant 0 : i32
    %c0_i32_0 = arith.constant 0 : i32
    %c0_i32_1 = arith.constant 0 : i32
    return %c0_i32, %c0_i32_0 : i32, i32
  }
  func.func @transform_3(%arg0: i32) -> (i32, i32) {
    %c0_i32 = arith.constant 0 : i32
    %c0_i32_0 = arith.constant 0 : i32
    %c0_i32_1 = arith.constant 0 : i32
    return %c0_i32, %c0_i32_0 : i32, i32
  }
  func.func @transform_4(%arg0: i32) -> (i32, i32) {
    %c0_i32 = arith.constant 0 : i32
    %c0_i32_0 = arith.constant 0 : i32
    %c0_i32_1 = arith.constant 0 : i32
    return %c0_i32, %c0_i32_0 : i32, i32
  }
  func.func @transform_5(%arg0: i32) -> (i32, i32) {
    %c0_i32 = arith.constant 0 : i32
    %c0_i32_0 = arith.constant 0 : i32
    return %arg0, %c0_i32 : i32, i32
  }
}

</mosaic_0001>

<bundles_post_ra>
// kernel: actor_forward.1
= control target key start
LH: loop header
LB: loop body
LE: loop exit
PB: predicated region body
PF: predicated region fallthrough
CT: control target
= control target key end

     0   :  { %vm39_vm0 = vcmask 1043456   ;;  %v472_v0 = vmov 0.0   ;;  %vm473_vm1 = vmmov 0   ;;  %vm35_vm2 = vcmask 64512   ;;  %s602_s1 = inlined_call_operand.vmem [shape: bf16[8,128], index: 1, kind: input, shape index: {}]   ;;  %s603_s0 = inlined_call_operand.vmem [shape: f32[8,8], index: 0, kind: input, shape index: {}]   ;;  %s604_s4 = inlined_call_operand.vmem [shape: f32[8,128], index: 4, kind: input, shape index: {}]   ;;  %s605_s2 = inlined_call_operand.vmem [shape: bf16[128,128], index: 2, kind: input, shape index: {}]   ;;  %s606_s3 = inlined_call_operand.vmem [shape: bf16[128,4], index: 3, kind: input, shape index: {}]   ;;  %s607_s5 = inlined_call_operand.vmem [shape: f32[8,4], index: 5, kind: output, shape index: {}]  }
   0x1   :  { %402 = vmatprep.subr.bf16.mxu0 %v472_v0  ;;  %v30_v1 = vld [vmem:[%s602_s1] sm:$0xf]  ;;  %404 = vmatprep.mubr.msk.bf16.mxu0 %vm473_vm1, %v472_v0  ;;  %v451_v13 = vld [vmem:[%s605_s2 + $0x8] sm:$0xff]   ;;  %v452_v14 = vld [vmem:[%s605_s2 + $0x10] sm:$0xff]   ;;  %vm352_vm3 = vcmask 31744  }
   0x2   :  { %v21_v2 = vld [vmem:[%s603_s0] sm:$0xff]  ;;  %v41_v3 = vsel %vm39_vm0, %v30_v1, 0  ;;  %408 = vmatprep.subr.bf16.mxu1 %v472_v0  ;;  %424 = vmatprep.mubr.msk.bf16.mxu1 %vm473_vm1, %v472_v0  ;;  %v453_v15 = vld [vmem:[%s605_s2 + $0x18] sm:$0xff]   ;;  %v455_v17 = vld [vmem:[%s605_s2 + $0x28] sm:$0xff]  }
   0x3   :  { %v22_v4 = vpack.c.bf16 %v21_v2, %v21_v2  ;;  %403 = vmatpush3.bf16.msra.mxu0 %v41_v3  ;;  %v358_v5 = vld [vmem:[%s604_s4] ss:$0 sm:$0xff]  ;;  %v456_v18 = vld [vmem:[%s605_s2 + $0x30] sm:$0xff]   ;;  %v457_v19 = vld [vmem:[%s605_s2 + $0x38] sm:$0xff]  }
   0x4   :  { %428 = vmatprep.subr.bf16.mxu0 %v472_v0  ;;  %v450_v12 = vld [vmem:[%s605_s2] sm:$0xff]   ;;  %v459_v45 = vld [vmem:[%s606_s3 + $0x8] sm:$0xff]   ;;  %v460_v46 = vld [vmem:[%s606_s3 + $0x10] sm:$0xff]  }
   0x5   :  { %409 = vmatpush3.bf16.msra.mxu1 %v450_v12  ;;  %v454_v16 = vld [vmem:[%s605_s2 + $0x20] sm:$0xff]   ;;  %v461_v47 = vld [vmem:[%s606_s3 + $0x18] sm:$0xff]   ;;  %v463_v49 = vld [vmem:[%s606_s3 + $0x28] sm:$0xff]  }
   0x6   :  { %405 = vmatmul.mubr.msk.bf16.vlgmr.msra.gmra.mrb[0].mxu0 %vm35_vm2, %v22_v4  ;;  %410 = vmatprep.subr.bf16.mxu1 %v472_v0  ;;  %v360_v30 = vld [vmem:[%s604_s4 + $0x1] ss:$0 sm:$0xff]  ;;  %v361_v32 = vld [vmem:[%s604_s4 + $0x2] ss:$0 sm:$0xff]  ;;  %v362_v37 = vld [vmem:[%s604_s4 + $0x3] ss:$0 sm:$0xff] }
   0x7   :  { %444 = vmatprep.mubr.msk.bf16.mxu0 %vm473_vm1, %v472_v0  ;;  %v458_v44 = vld [vmem:[%s606_s3] sm:$0xff]   ;;  %v464_v50 = vld [vmem:[%s606_s3 + $0x30] sm:$0xff]   ;;  %v465_v51 = vld [vmem:[%s606_s3 + $0x38] sm:$0xff]  }
   0x8   :  { %429 = vmatpush3.bf16.msra.mxu0 %v458_v44  ;;  %v462_v48 = vld [vmem:[%s606_s3 + $0x20] sm:$0xff]  }
   0x9   :  { %411 = vmatpush3.bf16.msra.mxu1 %v451_v13  ;;  %430 = vmatprep.subr.bf16.mxu0 %v472_v0  ;;  %v371_v62 = vld [vmem:[%s604_s4 + $0x4] ss:$0 sm:$0xff] }
   0xa   :  { %412 = vmatprep.subr.bf16.mxu1 %v472_v0 }
   0xc   :  { %431 = vmatpush3.bf16.msra.mxu0 %v459_v45 }
   0xd   :  { %413 = vmatpush3.bf16.msra.mxu1 %v452_v14  ;;  %432 = vmatprep.subr.bf16.mxu0 %v472_v0 }
   0xe   :  { %414 = vmatprep.subr.bf16.mxu1 %v472_v0 }
  0x10   :  { %433 = vmatpush3.bf16.msra.mxu0 %v460_v46 }
  0x11   :  { %415 = vmatpush3.bf16.msra.mxu1 %v453_v15  ;;  %434 = vmatprep.subr.bf16.mxu0 %v472_v0 }
  0x12   :  { %416 = vmatprep.subr.bf16.mxu1 %v472_v0 }
  0x14   :  { %435 = vmatpush3.bf16.msra.mxu0 %v461_v47 }
  0x15   :  { %417 = vmatpush3.bf16.msra.mxu1 %v454_v16  ;;  %436 = vmatprep.subr.bf16.mxu0 %v472_v0 }
  0x16   :  { %418 = vmatprep.subr.bf16.mxu1 %v472_v0 }
  0x18   :  { %437 = vmatpush3.bf16.msra.mxu0 %v462_v48 }
  0x19   :  { %419 = vmatpush3.bf16.msra.mxu1 %v455_v17  ;;  %438 = vmatprep.subr.bf16.mxu0 %v472_v0 }
  0x1a   :  { %420 = vmatprep.subr.bf16.mxu1 %v472_v0 }
  0x1c   :  { %439 = vmatpush3.bf16.msra.mxu0 %v463_v49 }
  0x1d   :  { %421 = vmatpush3.bf16.msra.mxu1 %v456_v18  ;;  %440 = vmatprep.subr.bf16.mxu0 %v472_v0 }
  0x1e   :  { %422 = vmatprep.subr.bf16.mxu1 %v472_v0 }
  0x20   :  { %441 = vmatpush3.bf16.msra.mxu0 %v464_v50 }
  0x21   :  { %423 = vmatpush3.bf16.msra.mxu1 %v457_v19  ;;  %442 = vmatprep.subr.bf16.mxu0 %v472_v0  ;;  %v372_v0 = vld [vmem:[%s604_s4 + $0x5] ss:$0 sm:$0xff] }
  0x24   :  { %443 = vmatpush3.bf16.msra.mxu0 %v465_v51 }
  0xd9   :  { %v77_v6 = vpop.f32.mrb[0].mxu0 }
  0xda   :  { %v78_v7 = vadd.f32 %v358_v5, %v77_v6  ;;  %v406_v8 = vpop.f32.mrb[1].mxu0  ;;  %v373_v5 = vld [vmem:[%s604_s4 + $0x6] ss:$0 sm:$0xff] }
  0xdb   :  { %v80_v9 = vpop.f32.mrb[2].mxu0 }
  0xdc   :  { %83 = vadd.xlane.f32.xlu0 %v78_v7  ;;  %v407_v10 = vpop.f32.mrb[3].mxu0  ;;  %v86_v11 = vmul.f32 %v78_v7, %v78_v7 }
  0xe0   :  { %87 = vadd.xlane.f32.xlu0 %v86_v11 }
 0x169   :  { %v84_v20 = vpop.xlane.xlu0 %83 }
 0x16a   :  { %v85_v21 = vmul.f32 0.03125, %v84_v20 }
 0x16c   :  { %v90_v23 = vmul.f32 %v85_v21, %v85_v21  ;;  %v93_v28 = vsub.f32 %v78_v7, %v85_v21 }
 0x16d   :  { %v88_v22 = vpop.xlane.xlu0 %87 }
 0x16e   :  { %v89_v24 = vmul.f32 0.03125, %v88_v22 }
 0x170   :  { %v91_v25 = vsub.f32 %v89_v24, %v90_v23 }
 0x172   :  { %v92_v26 = vmax.f32 %v91_v25, 0.0 }
 0x174   :  { %v94_v27 = vadd.f32 1e-05, %v92_v26 }
 0x176   :  { %466 = vrsqrt.f32 %v94_v27 }
 0x180   :  { %v467_v29 = vpop.eup %466 }
 0x181   :  { %v96_v31 = vmul.f32 %v467_v29, %v93_v28 }
 0x183   :  { %v101_v33 = vmul.f32 %v360_v30, %v96_v31 }
 0x185   :  { %v106_v34 = vadd.f32 %v361_v32, %v101_v33 }
 0x187   :  { %v107_v35 = vmax.f32 %v106_v34, 0.0 }
 0x189   :  { %v108_v36 = vpack.c.bf16 %v107_v35, %v107_v35 }
 0x18b   :  { %425 = vmatmul.mubr.bf16.vlgmr.msra.gmra.mrb[0].mxu1 %v108_v36 }
 0x25e   :  { %v211_v38 = vpop.f32.mrb[0].mxu1 }
 0x25f   :  { %v212_v39 = vadd.f32 %v362_v37, %v211_v38  ;;  %v426_v40 = vpop.f32.mrb[1].mxu1 }
 0x260   :  { %v214_v41 = vpop.f32.mrb[2].mxu1 }
 0x261   :  { %217 = vadd.xlane.f32.xlu1 %v212_v39  ;;  %v427_v42 = vpop.f32.mrb[3].mxu1  ;;  %v220_v43 = vmul.f32 %v212_v39, %v212_v39 }
 0x265   :  { %221 = vadd.xlane.f32.xlu1 %v220_v43 }
 0x2ee   :  { %v218_v52 = vpop.xlane.xlu1 %217 }
 0x2ef   :  { %v219_v53 = vmul.f32 0.03125, %v218_v52 }
 0x2f1   :  { %v224_v55 = vmul.f32 %v219_v53, %v219_v53  ;;  %v227_v60 = vsub.f32 %v212_v39, %v219_v53 }
 0x2f2   :  { %v222_v54 = vpop.xlane.xlu1 %221 }
 0x2f3   :  { %v223_v56 = vmul.f32 0.03125, %v222_v54 }
 0x2f5   :  { %v225_v57 = vsub.f32 %v223_v56, %v224_v55 }
 0x2f7   :  { %v226_v58 = vmax.f32 %v225_v57, 0.0 }
 0x2f9   :  { %v228_v59 = vadd.f32 1e-05, %v226_v58 }
 0x2fb   :  { %468 = vrsqrt.f32 %v228_v59 }
 0x305   :  { %v469_v61 = vpop.eup %468 }
 0x306   :  { %v230_v63 = vmul.f32 %v469_v61, %v227_v60 }
 0x308   :  { %v235_v1 = vmul.f32 %v371_v62, %v230_v63 }
 0x30a   :  { %v240_v2 = vadd.f32 %v372_v0, %v235_v1 }
 0x30c   :  { %v241_v3 = vmax.f32 %v240_v2, 0.0 }
 0x30e   :  { %v242_v4 = vpack.c.bf16 %v241_v3, %v241_v3 }
 0x310   :  { %445 = vmatmul.mubr.bf16.vlgmr.msra.gmra.mrb[4].mxu0 %v242_v4 }
 0x3e3   :  { %v345_v6 = vpop.f32.mrb[4].mxu0 }
 0x3e4   :  { %v346_v7 = vadd.f32 %v373_v5, %v345_v6  ;;  %v446_v8 = vpop.f32.mrb[5].mxu0 }
 0x3e5   :  { %v348_v9 = vpop.f32.mrb[6].mxu0 }
 0x3e6   :  { %470 = vtanh.f32 %v346_v7  ;;  %v447_v10 = vpop.f32.mrb[7].mxu0 }
 0x3f0   :  { %v471_v11 = vpop.eup %470 }
 0x3f1   :  { %353 = vst.msk [vmem:[%s607_s5] sm:$0xff] %vm352_vm3, %v471_v11 }

</bundles_post_ra>
